<compile_context>
chip_gen: v7x
topology: tpu7x:2x2x1
jax: 0.10.0
libtpu: 0.0.40
codegen_flags: <defaults>
</compile_context>

<pallas_src>
import functools
import math

import jax
import jax.numpy as jnp
import numpy as np
from jax import lax
from jax.experimental import pallas as pl
from jax.experimental.pallas import tpu as pltpu


_NEG_BIG = -1e30  # "-inf" stand-in for padded score lanes (exp -> exactly 0 in f32)


# ----------------------------------------------------------------------------
# In-kernel helpers
# ----------------------------------------------------------------------------
def _dot_t(a, b):
    """(M, K) x (N, K) -> (M, N): contract the last (lane) dims on the MXU."""
    return lax.dot_general(a, b, (((1,), (1,)), ((), ())),
                           preferred_element_type=jnp.float32)


def _softmax_lanes(x):
    """Numerically-stable softmax over the last (lane) axis.  x: (TB, S_pad) f32."""
    m = jnp.max(x, axis=-1, keepdims=True)
    p = jnp.exp(x - m)
    s = jnp.sum(p, axis=-1, keepdims=True)
    r = pl.reciprocal(s, approx=True)      # EUP slot (otherwise idle) -> ~free
    r = r * (2.0 - s * r)                  # 2x Newton-Raphson -> f32-accurate
    r = r * (2.0 - s * r)
    return p * r


def _neg_pad(n_pad):
    """(1, n_pad) block of -1e30 used to lane-pad score rows (built once)."""
    if n_pad == 0:
        return None
    return jnp.full((1, n_pad), _NEG_BIG, jnp.float32)


def _store_row(o_ref, b, row, neg_pad):
    """Write one (1, S) score row, lane-padded to (1, S_pad), into o_ref[b]."""
    if neg_pad is not None:
        row = jnp.concatenate([row, neg_pad], axis=1)   # lane-dense (1, S_pad)
    o_ref[b:b + 1, :] = row


def _softmax_inplace(o_ref):
    """One batched softmax over the whole (TB, S_pad) score block."""
    o_ref[...] = _softmax_lanes(o_ref[...])


# ----------------------------------------------------------------------------
# Kernels (TB batch rows per grid program; seq-major encoder blocks)
# ----------------------------------------------------------------------------
def _dot_kernel(h_ref, e_ref, o_ref):
    # h_ref: (1, TB, H), e_ref: (S, TB, H), o_ref: (TB, S_pad)
    tb = h_ref.shape[1]
    s = e_ref.shape[0]
    neg = _neg_pad(o_ref.shape[-1] - s)
    q = h_ref[0]                                           # (TB, H)
    for b in range(tb):                                    # static unroll, TB <= 8
        row = _dot_t(q[b:b + 1, :], e_ref[:, b, :])        # (1, S)  MXU
        _store_row(o_ref, b, row, neg)
    _softmax_inplace(o_ref)


def _general_kernel(h_ref, e_ref, w_ref, o_ref):
    # scores = (h @ W) . e ; the Linear bias contributes a per-row constant and
    # is dropped (softmax over S is shift-invariant).
    tb = h_ref.shape[1]
    s = e_ref.shape[0]
    neg = _neg_pad(o_ref.shape[-1] - s)
    q = jnp.dot(h_ref[0], w_ref[...],
                preferred_element_type=jnp.float32)        # (TB, H)  one MXU matmul/block
    for b in range(tb):
        row = _dot_t(q[b:b + 1, :], e_ref[:, b, :])        # (1, S)  MXU
        _store_row(o_ref, b, row, neg)
    _softmax_inplace(o_ref)


def _concat_kernel(h_ref, e_ref, w1_ref, w2_ref, b_ref, v_ref, o_ref):
    # energy = tanh(h @ W1.T + e @ W2.T + b); scores = energy @ v.T
    tb = h_ref.shape[1]
    s = e_ref.shape[0]
    neg = _neg_pad(o_ref.shape[-1] - s)
    hw = _dot_t(h_ref[0], w1_ref[...])                     # (TB, H)  h @ W1.T, once/block
    bias = b_ref[...]                                      # (1, H)
    v = v_ref[...]                                         # (1, H)
    w2 = w2_ref[...]                                       # (H, H)
    for b in range(tb):                                    # static unroll, TB <= 8
        ew = _dot_t(e_ref[:, b, :], w2)                    # (S, H)  e @ W2.T  MXU
        energy = jnp.tanh(ew + hw[b:b + 1, :] + bias)      # (S, H)  tanh on EUP
        row = _dot_t(v, energy)                            # (1, S)  v-reduce on MXU
        _store_row(o_ref, b, row, neg)
    _softmax_inplace(o_ref)


# ----------------------------------------------------------------------------
# One-time parameter preprocessing (outside jit, done at load time)
# ----------------------------------------------------------------------------
def prepare_params(method, raw, hidden_size):
    if method == "dot":
        return {}
    if method == "general":
        # Bias is dropped in-kernel (constant per batch row under softmax).
        return {"attn_w": raw["attn_w"]}
    if method == "concat":
        w = raw["attn_w"]                                  # (H, 2H)
        return {"w1": w[:, :hidden_size],                  # hidden half   (H, H)
                "w2": w[:, hidden_size:],                  # encoder half  (H, H)
                "b": raw["attn_b"].reshape(1, hidden_size),
                "v": raw["v"]}                             # (1, H)
    raise ValueError(method)


def _pick_tb(batch):
    """Batch rows per grid step; always divides B exactly (no ragged blocks)."""
    if batch <= 8:
        return batch
    if batch % 8 == 0:
        return 8
    return math.gcd(batch, 8)   # 4 / 2 / 1 fallback.  TODO(synk): ragged batches.


# ----------------------------------------------------------------------------
# Forward wrapper
# ----------------------------------------------------------------------------
@functools.partial(jax.jit, static_argnames=("method",))
def attn_forward(method, hidden, encoder_outputs, params):
    S, B, H = encoder_outputs.shape
    S_pad = ((S + 127) // 128) * 128                       # lane-dense output width
    TB = _pick_tb(B)
    grid = (B // TB,)

    # Native layouts; no XLA transposes of hidden / encoder_outputs.
    h_spec = pl.BlockSpec((1, TB, H), lambda b: (0, b, 0))
    e_spec = pl.BlockSpec((S, TB, H), lambda b: (0, b, 0))
    o_spec = pl.BlockSpec((TB, S_pad), lambda b: (b, 0))

    def full_spec(shape):
        nd = len(shape)
        return pl.BlockSpec(shape, lambda b, _nd=nd: (0,) * _nd)

    if method == "dot":
        kernel, extra = _dot_kernel, ()
    elif method == "general":
        kernel, extra = _general_kernel, (params["attn_w"],)
    elif method == "concat":
        kernel, extra = _concat_kernel, (params["w1"], params["w2"],
                                         params["b"], params["v"])
    else:
        raise ValueError(method)

    in_specs = [h_spec, e_spec] + [full_spec(a.shape) for a in extra]

    out = pl.pallas_call(
        kernel,
        out_shape=jax.ShapeDtypeStruct((B, S_pad), jnp.float32),
        grid_spec=pltpu.PrefetchScalarGridSpec(
            num_scalar_prefetch=0,
            grid=grid,
            in_specs=in_specs,
            out_specs=o_spec),
        compiler_params=pltpu.CompilerParams(
            dimension_semantics=("parallel",)),
    )(hidden, encoder_outputs, *extra)

    # (B, S_pad) -> (B, 1, S): drop pad lanes, restore the unsqueeze(1).
    return out[:, None, :S]


# ----------------------------------------------------------------------------
# Pure-JAX reference (mirrors the PyTorch forward exactly, uses raw params)
# ----------------------------------------------------------------------------
def attn_reference(method, hidden, encoder_outputs, params):
    if method == "dot":
        scores = jnp.sum(hidden * encoder_outputs, axis=2)                 # (S, B)
    elif method == "general":
        energy = encoder_outputs @ params["attn_w"].T + params["attn_b"]
        scores = jnp.sum(hidden * energy, axis=2)
    elif method == "concat":
        S = encoder_outputs.shape[0]
        hexp = jnp.broadcast_to(hidden, (S,) + hidden.shape[1:])
        cat = jnp.concatenate([hexp, encoder_outputs], axis=2)
        energy = jnp.tanh(cat @ params["attn_w"].T + params["attn_b"])
        scores = jnp.sum(params["v"] * energy, axis=2)
    st = scores.T                                                          # (B, S)
    return jax.nn.softmax(st, axis=1)[:, None, :]                          # (B, 1, S)


# ----------------------------------------------------------------------------
# Main
# ----------------------------------------------------------------------------
if __name__ == "__main__":
    S, B, H = 8, 2, 32
    key = jax.random.PRNGKey(0)
    k1, k2, k3, k4, k5, k6, k7 = jax.random.split(key, 7)

    hidden = jax.random.normal(k1, (1, B, H), jnp.float32)
    encoder_outputs = jax.random.normal(k2, (S, B, H), jnp.float32)

    # Deterministic synthetic parameters (shapes match nn.Linear / nn.Parameter).
    raw_params = {
        "general": {
            "attn_w": jax.random.normal(k3, (H, H), jnp.float32) * 0.1,
            "attn_b": jax.random.normal(k4, (H,), jnp.float32) * 0.1,
        },
        "concat": {
            "attn_w": jax.random.normal(k5, (H, 2 * H), jnp.float32) * 0.1,
            "attn_b": jax.random.normal(k6, (H,), jnp.float32) * 0.1,
            "v": jax.random.normal(k7, (1, H), jnp.float32) * 0.1,
        },
        "dot": {},
    }
    # One-time weight preprocessing (outside jit, per parameter load).
    prepped = {m: prepare_params(m, raw_params[m], H)
               for m in ("dot", "general", "concat")}

    for method in ("dot", "general", "concat"):
        out = attn_forward(method, hidden, encoder_outputs, prepped[method])
        out = jax.block_until_ready(out)
        ref = attn_reference(method, hidden, encoder_outputs, raw_params[method])
        assert out.shape == (B, 1, S), (method, out.shape)
        np.testing.assert_allclose(np.asarray(out), np.asarray(ref),
                                   rtol=1e-5, atol=1e-5)

    print("KERNEL_OK")
</pallas_src>

<mosaic_0001>
module attributes {stable_mosaic.version = 11 : i64} {
  func.func @_dot_kernel(%arg0: i32, %arg1: memref<1x2x32xf32, #tpu.memory_space<vmem>>, %arg2: memref<8x2x32xf32, #tpu.memory_space<vmem>>, %arg3: memref<2x128xf32, #tpu.memory_space<vmem>>) attributes {dimension_semantics = [#tpu.dimension_semantics<parallel>], iteration_bounds = array<i64: 1>, scalar_prefetch = 0 : i64, scratch_operands = 0 : i64, tpu.core_type = #tpu.core_type<tc>, window_params = [{transform_indices = @transform_0, window_bounds = array<i64: 1, 2, 32>}, {transform_indices = @transform_1, window_bounds = array<i64: 8, 2, 32>}, {transform_indices = @transform_2, window_bounds = array<i64: 2, 128>}]} {
    %cst = arith.constant -1.000000e+30 : f32
    %0 = vector.broadcast %cst : f32 to vector<1x120xf32>
    %c0 = arith.constant 0 : index
    %c0_0 = arith.constant 0 : index
    %c0_1 = arith.constant 0 : index
    %1 = vector.load %arg1[%c0, %c0_0, %c0_1] : memref<1x2x32xf32, #tpu.memory_space<vmem>>, vector<1x2x32xf32>
    %2 = vector.shape_cast %1 : vector<1x2x32xf32> to vector<2x32xf32>
    %3 = vector.extract_strided_slice %2 {offsets = [0, 0], sizes = [1, 32], strides = [1, 1]} : vector<2x32xf32> to vector<1x32xf32>
    %c0_2 = arith.constant 0 : index
    %c0_3 = arith.constant 0 : index
    %c0_4 = arith.constant 0 : index
    %4 = vector.load %arg2[%c0_2, %c0_3, %c0_4] : memref<8x2x32xf32, #tpu.memory_space<vmem>>, vector<8x1x32xf32>
    %5 = vector.shape_cast %4 : vector<8x1x32xf32> to vector<8x32xf32>
    %cst_5 = arith.constant dense<0.000000e+00> : vector<1x8xf32>
    %6 = tpu.matmul %3, %5, %cst_5 {dimension_numbers = #tpu.dot_dimension_numbers<[1], [1], [0], [0], [0, 0, 1, 0], [], []>} : vector<1x32xf32>, vector<8x32xf32>, vector<1x8xf32> -> vector<1x8xf32>
    %7 = tpu.concatenate %6, %0 in 1 : vector<1x8xf32>, vector<1x120xf32> -> vector<1x128xf32>
    %c0_6 = arith.constant 0 : index
    %c0_7 = arith.constant 0 : index
    %8 = vector.load %arg3[%c0_6, %c0_7] : memref<2x128xf32, #tpu.memory_space<vmem>>, vector<1x128xf32>
    tpu.vector_store %arg3[%c0_6, %c0_7], %7 {strides = array<i32>} : memref<2x128xf32, #tpu.memory_space<vmem>>, vector<1x128xf32>,
    %9 = vector.extract_strided_slice %2 {offsets = [1, 0], sizes = [1, 32], strides = [1, 1]} : vector<2x32xf32> to vector<1x32xf32>
    %c0_8 = arith.constant 0 : index
    %c1 = arith.constant 1 : index
    %c0_9 = arith.constant 0 : index
    %10 = vector.load %arg2[%c0_8, %c1, %c0_9] : memref<8x2x32xf32, #tpu.memory_space<vmem>>, vector<8x1x32xf32>
    %11 = vector.shape_cast %10 : vector<8x1x32xf32> to vector<8x32xf32>
    %cst_10 = arith.constant dense<0.000000e+00> : vector<1x8xf32>
    %12 = tpu.matmul %9, %11, %cst_10 {dimension_numbers = #tpu.dot_dimension_numbers<[1], [1], [0], [0], [0, 0, 1, 0], [], []>} : vector<1x32xf32>, vector<8x32xf32>, vector<1x8xf32> -> vector<1x8xf32>
    %13 = tpu.concatenate %12, %0 in 1 : vector<1x8xf32>, vector<1x120xf32> -> vector<1x128xf32>
    %c1_11 = arith.constant 1 : index
    %c0_12 = arith.constant 0 : index
    %14 = vector.load %arg3[%c1_11, %c0_12] : memref<2x128xf32, #tpu.memory_space<vmem>>, vector<1x128xf32>
    tpu.vector_store %arg3[%c1_11, %c0_12], %13 {strides = array<i32>} : memref<2x128xf32, #tpu.memory_space<vmem>>, vector<1x128xf32>,
    %c0_13 = arith.constant 0 : index
    %c0_14 = arith.constant 0 : index
    %15 = vector.load %arg3[%c0_13, %c0_14] : memref<2x128xf32, #tpu.memory_space<vmem>>, vector<2x128xf32>
    %cst_15 = arith.constant dense<0xFF800000> : vector<2xf32>
    %16 = vector.multi_reduction <maximumf>, %15, %cst_15 [1] : vector<2x128xf32> to vector<2xf32>
    %17 = vector.shape_cast %16 : vector<2xf32> to vector<2x1xf32>
    %18 = vector.broadcast %17 : vector<2x1xf32> to vector<2x128xf32>
    %19 = arith.subf %15, %18 : vector<2x128xf32>
    %20 = math.exp %19 : vector<2x128xf32>
    %cst_16 = arith.constant dense<0.000000e+00> : vector<2xf32>
    %21 = vector.multi_reduction <add>, %20, %cst_16 [1] : vector<2x128xf32> to vector<2xf32>
    %22 = vector.shape_cast %21 : vector<2xf32> to vector<2x1xf32>
    %23 = tpu.reciprocal %22 {approx = true} : vector<2x1xf32> -> vector<2x1xf32>
    %24 = arith.mulf %22, %23 : vector<2x1xf32>
    %cst_17 = arith.constant 2.000000e+00 : f32
    %25 = vector.broadcast %cst_17 : f32 to vector<2x1xf32>
    %26 = arith.subf %25, %24 : vector<2x1xf32>
    %27 = arith.mulf %23, %26 : vector<2x1xf32>
    %28 = arith.mulf %22, %27 : vector<2x1xf32>
    %cst_18 = arith.constant 2.000000e+00 : f32
    %29 = vector.broadcast %cst_18 : f32 to vector<2x1xf32>
    %30 = arith.subf %29, %28 : vector<2x1xf32>
    %31 = arith.mulf %27, %30 : vector<2x1xf32>
    %32 = vector.broadcast %31 : vector<2x1xf32> to vector<2x128xf32>
    %33 = arith.mulf %20, %32 : vector<2x128xf32>
    %c0_19 = arith.constant 0 : index
    %c0_20 = arith.constant 0 : index
    %34 = vector.load %arg3[%c0_19, %c0_20] : memref<2x128xf32, #tpu.memory_space<vmem>>, vector<2x128xf32>
    tpu.vector_store %arg3[%c0_19, %c0_20], %33 {strides = array<i32>} : memref<2x128xf32, #tpu.memory_space<vmem>>, vector<2x128xf32>,
    return
  }
  func.func @transform_0(%arg0: i32) -> (i32, i32, i32) {
    %c0_i32 = arith.constant 0 : i32
    %c0_i32_0 = arith.constant 0 : i32
    %c0_i32_1 = arith.constant 0 : i32
    return %c0_i32, %arg0, %c0_i32_0 : i32, i32, i32
  }
  func.func @transform_1(%arg0: i32) -> (i32, i32, i32) {
    %c0_i32 = arith.constant 0 : i32
    %c0_i32_0 = arith.constant 0 : i32
    %c0_i32_1 = arith.constant 0 : i32
    return %c0_i32, %arg0, %c0_i32_0 : i32, i32, i32
  }
  func.func @transform_2(%arg0: i32) -> (i32, i32) {
    %c0_i32 = arith.constant 0 : i32
    %c0_i32_0 = arith.constant 0 : i32
    return %arg0, %c0_i32 : i32, i32
  }
}

</mosaic_0001>

<bundles_post_ra>
// kernel: attn_forward.1
= control target key start
LH: loop header
LB: loop body
LE: loop exit
PB: predicated region body
PF: predicated region fallthrough
CT: control target
= control target key end

     0   :  { %7 = vsyncpa [#allocation3], 0  ;;  %s482_s0 = inlined_call_operand.hbm [shape: f32[1,2,32], index: 0, kind: input, shape index: {}]   ;;  %s483_s1 = inlined_call_operand.hbm [shape: f32[8,2,32], index: 1, kind: input, shape index: {}]   ;;  %s484_s2 = inlined_call_operand.hbm [shape: f32[2,128], index: 2, kind: output, shape index: {}]  }
   0x1   :  { %8 = vsyncpa [#allocation6], 0 }
   0x2   :  { %9 = vsyncpa [#allocation4], 0  ;;  %s399_s9 = smov [#allocation2]   ;;  %s400_s11 = smov [#allocation5]  }
   0x3   :  { %s16_s10 = sshll.u32 %s399_s9, 4  ;;  %s25_s12 = sshll.u32 %s400_s11, 4  ;;  %s17_s10 = int_to_ptr.vmem [resolvable:$true] %s16_s10  ;;  %s421_s12 = int_to_ptr.vmem [resolvable:$true] %s25_s12 }
   0x4   :  { %s327_s15 = scalar_lea.hbm %s482_s0, 32 }
   0x5   :  { %p328_p0 = scmp.ne.s32.totalorder %s482_s0, %s327_s15  ;;  %p331_p1 = scmp.lt.u32.totalorder %s327_s15, %s482_s0 }
   0x7   :  { %p333_p2 = pnand %p331_p1, %p328_p0 }
   0x9   :  { %336 = shalt.err (!%p333_p2)
}
   0xa   :  { %s337_s20 = scalar_lea.vmem %s17_s10, 32  ;;  %p342_p4 = scmp.lt.s32.totalorder %s17_s10, %s17_s10 }
   0xb   :  { %p338_p3 = scmp.ne.s32.totalorder %s17_s10, %s337_s20  ;;  %p343_p5 = scmp.lt.s32.totalorder %s337_s20, %s337_s20 }
   0xd   :  { %p344_p6 = por %p343_p5, %p342_p4 }
   0xf   :  { %p345_p7 = pnand %p344_p6, %p338_p3 }
  0x11   :  { %348 = shalt.err (!%p345_p7)
}
  0x12   :  { %19 = dma.hbm_to_vmem [thread:$0]  %s482_s0, 32, %s17_s10, [#allocation3]  }
  0x13   :  { %s349_s25 = scalar_lea.hbm %s483_s1, 256 }
  0x14   :  { %p350_p8 = scmp.ne.s32.totalorder %s483_s1, %s349_s25  ;;  %p353_p9 = scmp.lt.u32.totalorder %s349_s25, %s483_s1 }
  0x16   :  { %p355_p10 = pnand %p353_p9, %p350_p8 }
  0x18   :  { %358 = shalt.err (!%p355_p10)
}
  0x19   :  { %s359_s30 = scalar_lea.vmem %s421_s12, 256  ;;  %p364_p12 = scmp.lt.s32.totalorder %s421_s12, %s421_s12 }
  0x1a   :  { %p360_p11 = scmp.ne.s32.totalorder %s421_s12, %s359_s30  ;;  %p365_p13 = scmp.lt.s32.totalorder %s359_s30, %s359_s30 }
  0x1c   :  { %p366_p0 = por %p365_p13, %p364_p12 }
  0x1e   :  { %p367_p1 = pnand %p366_p0, %p360_p11 }
  0x20   :  { %370 = shalt.err (!%p367_p1)
}
  0x21   :  { %s401_s0 = smov 32   ;;  %s402_s3 = smov 2  }
  0x22   :  { %31 = dma.hbm_to_vmem [thread:$0]  %s483_s1, 256, %s421_s12, [#allocation6], %s401_s0, %s401_s0, %s402_s3  }
  0x23   :  { %393 = dma.done.wait [#allocation3], 32  }
  0x24   :  { %394 = vsyncadd [#allocation3], 4294967264 }
  0x25   :  { %395 = dma.done.wait [#allocation6], 256  }
  0x26   :  { %396 = vsyncadd [#allocation6], 4294967040  ;;  %v403_v0 = vmov 0.0   ;;  %vm404_vm0 = vmmov 0   ;;  %vm56_vm1 = vcmask 1041409   ;;  %vm59_vm2 = vcmask 1042434  }
  0x27   :  { %306 = vmatprep.subr.mxu0 %v403_v0  ;;  %311 = vmatprep.subr.mxu1 %v403_v0  ;;  %vm62_vm3 = vcmask 1043459   ;;  %vm65_vm4 = vcmask 1044484   ;;  %v39_v1 = vld [vmem:[#allocation5] sm:$0x1]  ;;  %v40_v2 = vld [vmem:[#allocation5 + $0x2] sm:$0x1] }
  0x28   :  { %308 = vmatprep.mubr.msk.f32.mxu0 %vm404_vm0, %v403_v0  ;;  %313 = vmatprep.mubr.msk.f32.mxu1 %vm404_vm0, %v403_v0  ;;  %v41_v3 = vld [vmem:[#allocation5 + $0x4] sm:$0x1]  ;;  %v42_v4 = vld [vmem:[#allocation5 + $0x6] sm:$0x1]  ;;  %v43_v5 = vld [vmem:[#allocation5 + $0x8] sm:$0x1] }
  0x29   :  { %v44_v6 = vld [vmem:[#allocation5 + $0xa] sm:$0x1]  ;;  %v45_v7 = vld [vmem:[#allocation5 + $0xc] sm:$0x1]  ;;  %v55_v8 = vrot.slane %v40_v2, 7  ;;  %v58_v9 = vrot.slane %v41_v3, 6 }
  0x2a   :  { %vm68_vm5 = vcmask 1045509   ;;  %vm71_vm6 = vcmask 1046534   ;;  %v46_v10 = vld [vmem:[#allocation5 + $0xe] sm:$0x1]  ;;  %v61_v11 = vrot.slane %v42_v4, 5  ;;  %v64_v12 = vrot.slane %v43_v5, 4 }
  0x2b   :  { %v67_v13 = vrot.slane %v44_v6, 3  ;;  %v70_v14 = vrot.slane %v45_v7, 2  ;;  %v57_v15 = vsel %vm56_vm1, %v55_v8, %v39_v1  ;;  %v155_v16 = vld [vmem:[#allocation5 + $0x1] sm:$0x1]  ;;  %v156_v17 = vld [vmem:[#allocation5 + $0x3] sm:$0x1] }
  0x2c   :  { %v157_v18 = vld [vmem:[#allocation5 + $0x5] sm:$0x1]  ;;  %v60_v19 = vsel %vm59_vm2, %v58_v9, %v57_v15  ;;  %v158_v20 = vld [vmem:[#allocation5 + $0x7] sm:$0x1]  ;;  %v159_v21 = vld [vmem:[#allocation5 + $0x9] sm:$0x1] }
  0x2d   :  { %v160_v22 = vld [vmem:[#allocation5 + $0xb] sm:$0x1]  ;;  %v63_v23 = vsel %vm62_vm3, %v61_v11, %v60_v19  ;;  %v73_v24 = vrot.slane %v46_v10, 1  ;;  %v161_v25 = vld [vmem:[#allocation5 + $0xd] sm:$0x1]  ;;  %v172_v26 = vrot.slane %v156_v17, 7 }
  0x2e   :  { %v174_v27 = vrot.slane %v157_v18, 6  ;;  %v66_v28 = vsel %vm65_vm4, %v64_v12, %v63_v23  ;;  %vm74_vm7 = vcmask 1047559   ;;  %v162_v29 = vld [vmem:[#allocation5 + $0xf] sm:$0x1]  ;;  %v176_v30 = vrot.slane %v158_v20, 5  ;;  %s405_s1 = smov [#allocation7]  }
  0x2f   :  { %v178_v31 = vrot.slane %v159_v21, 4  ;;  %v69_v32 = vsel %vm68_vm5, %v67_v13, %v66_v28  ;;  %vm76_vm8 = vcmask 261120   ;;  %v173_v33 = vsel %vm56_vm1, %v172_v26, %v155_v16  ;;  %v38_v42 = vld [vmem:[#allocation2] sm:$0x3]  ;;  %s288_s6 = sshll.u32 %s405_s1, 4  ;;  %s289_s6 = int_to_ptr.vmem [resolvable:$true] %s288_s6 }
  0x30   :  { %v180_v34 = vrot.slane %v160_v22, 3  ;;  %v72_v35 = vsel %vm71_vm6, %v70_v14, %v69_v32  ;;  %v175_v36 = vsel %vm59_vm2, %v174_v27, %v173_v33  ;;  %v182_v37 = vrot.slane %v161_v25, 2  ;;  %s371_s7 = scalar_lea.vmem %s289_s6, 32  ;;  %p376_p3 = scmp.lt.s32.totalorder %s289_s6, %s289_s6 }
  0x31   :  { %v75_v38 = vsel %vm74_vm7, %v73_v24, %v72_v35  ;;  %v177_v39 = vsel %vm62_vm3, %v176_v30, %v175_v36  ;;  %v184_v40 = vrot.slane %v162_v29, 1  ;;  %v163_v46 = vrot.slane %v38_v42, 1  ;;  %p372_p2 = scmp.ne.s32.totalorder %s289_s6, %s371_s7  ;;  %p377_p4 = scmp.lt.s32.totalorder %s371_s7, %s371_s7 }
  0x32   :  { %307 = vmatpush3.xpose.msk.msra.mxu0 %vm76_vm8, %v75_v38  ;;  %v179_v41 = vsel %vm65_vm4, %v178_v31, %v177_v39  ;;  %vm152_vm9 = vcmask 64512   ;;  %vm263_vm10 = vcmask 1041408  }
  0x33   :  { %v181_v43 = vsel %vm68_vm5, %v180_v34, %v179_v41  ;;  %p378_p5 = por %p377_p4, %p376_p3 }
  0x34   :  { %v183_v44 = vsel %vm71_vm6, %v182_v37, %v181_v43 }
  0x35   :  { %v185_v45 = vsel %vm74_vm7, %v184_v40, %v183_v44  ;;  %309 = vmatmul.mubr.msk.f32.vlgmr.msra.gmra.mrb[0].mxu0 %vm76_vm8, %v38_v42  ;;  %p379_p6 = pnand %p378_p5, %p372_p2 }
  0x36   :  { %312 = vmatpush3.xpose.msk.msra.mxu1 %vm76_vm8, %v185_v45 }
  0x39   :  { %314 = vmatmul.mubr.msk.f32.vlgmr.msra.gmra.mrb[0].mxu1 %vm76_vm8, %v163_v46 }
 0x108   :  { %v148_v47 = vpop.f32.mrb[0].mxu0 }
 0x109   :  { %v153_v48 = vsel %vm152_vm9, %v148_v47, -1e+30  ;;  %v310_v49 = vpop.f32.mrb[1].mxu0 }
 0x10a   :  { %154 = vst [vmem:[#allocation7] sm:$0x1] %v153_v48 }
 0x10c   :  { %v256_v50 = vpop.f32.mrb[0].mxu1 }
 0x10d   :  { %v260_v51 = vsel %vm152_vm9, %v256_v50, -1e+30  ;;  %v315_v52 = vpop.f32.mrb[1].mxu1 }
 0x10e   :  { %261 = vst [vmem:[#allocation7 + $0x1] sm:$0x1] %v260_v51 }
 0x115   :  { %v262_v53 = vld [vmem:[#allocation7] sm:$0x3] }
 0x116   :  { %v264_v54 = vsel %vm263_vm10, %v262_v53, -inf }
 0x117   :  { %265 = vmax.xlane.f32.xlu0 %v264_v54 }
 0x1a4   :  { %v266_v55 = vpop.xlane.xlu0 %265 }
 0x1a5   :  { %v267_v56 = vsub.f32 %v262_v53, %v266_v55 }
 0x1a7   :  { %v268_v57 = vmul.f32 1.442695, %v267_v56 }
 0x1a9   :  { %323 = vpow2.f32 %v268_v57 }
 0x1b3   :  { %v324_v58 = vpop.eup %323 }
 0x1b4   :  { %v270_v59 = vsel %vm263_vm10, %v324_v58, 0.0 }
 0x1b5   :  { %271 = vadd.xlane.f32.xlu0 %v270_v59 }
 0x242   :  { %v272_v60 = vpop.xlane.xlu0 %271 }
 0x243   :  { %325 = vrcp.f32 %v272_v60 }
 0x24d   :  { %v326_v61 = vpop.eup %325 }
 0x24e   :  { %v274_v62 = vmul.f32 %v326_v61, %v272_v60 }
 0x250   :  { %v275_v63 = vsub.f32 2.0, %v274_v62 }
 0x252   :  { %v276_v0 = vmul.f32 %v326_v61, %v275_v63 }
 0x254   :  { %v277_v1 = vmul.f32 %v276_v0, %v272_v60 }
 0x256   :  { %v278_v2 = vsub.f32 2.0, %v277_v1 }
 0x258   :  { %v279_v3 = vmul.f32 %v278_v2, %v276_v0 }
 0x25a   :  { %v280_v4 = vmul.f32 %v324_v58, %v279_v3 }
 0x25c   :  { %281 = vst [vmem:[#allocation7] sm:$0x3] %v280_v4 }
 0x25d   :  { %382 = shalt.err (!%p379_p6)
}
 0x25e   :  { %s383_s10 = scalar_lea.hbm %s484_s2, 32 }
 0x25f   :  { %p384_p7 = scmp.ne.s32.totalorder %s484_s2, %s383_s10  ;;  %p387_p8 = scmp.lt.u32.totalorder %s383_s10, %s484_s2 }
 0x261   :  { %p389_p9 = pnand %p387_p8, %p384_p7 }
 0x263   :  { %392 = shalt.err (!%p389_p9)
}
 0x264   :  { %291 = dma.vmem_to_hbm [thread:$0]  %s289_s6, 32, %s484_s2, [#allocation4]  }
 0x265   :  { %397 = dma.done.wait [#allocation4], 32  }
 0x266   :  { %398 = vsyncadd [#allocation4], 4294967264 }
 0x267   :  { %295 = vsyncpa [#allocation3], 1 }
 0x268   :  { %296 = vsyncpa [#allocation6], 1 }
 0x269   :  { %297 = vsyncpa [#allocation4], 1 }

</bundles_post_ra>
